<compile_context>
chip_gen: v6e
topology: v6e:2x2x1
jax: 0.10.0
libtpu: 0.0.40
codegen_flags: <defaults>
</compile_context>

<pallas_src>
import jax
import jax.numpy as jnp
from jax.experimental import pallas as pl
from jax.experimental.pallas import tpu as pltpu

_BN_EPS = 1e-5


def _round_up(n, m):
    return (n + m - 1) // m * m


def _pick_tile(dim):
    # dim is always a multiple of 128.
    for c in (512, 384, 256, 128):
        if dim % c == 0:
            return c
    return 128


# ----------------------------------------------------------------------------
# Pallas kernel 1: tiled GEMM (bf16 in, f32 acc) with fused scale/shift
# (+ optional ReLU) epilogue.
# ----------------------------------------------------------------------------
def _make_mm_kernel(act):
    def kernel(a_ref, b_ref, s_ref, t_ref, o_ref, acc_ref):
        @pl.when(pl.program_id(2) == 0)
        def _init():
            acc_ref[...] = jnp.zeros_like(acc_ref)

        acc_ref[...] += jnp.dot(a_ref[...], b_ref[...],
                                preferred_element_type=jnp.float32)

        @pl.when(pl.program_id(2) == pl.num_programs(2) - 1)
        def _fin():
            r = acc_ref[...] * s_ref[...] + t_ref[...]
            if act == "relu":
                r = jnp.maximum(r, 0.0)
            o_ref[...] = r.astype(o_ref.dtype)

    return kernel


_MM_KERNELS = {"none": _make_mm_kernel("none"), "relu": _make_mm_kernel("relu")}


def pallas_matmul_prepped(a, p, act):
    """out = act((a @ Wm) * scale + shift)[:, :cout].

    a: (M, K) f32/bf16 activations.  p carries pre-padded bf16 weight matrix
    (Kp, Np), f32 scale/shift (1, Np), and the true cout.
    """
    M, K = a.shape
    wm, s_p, t_p = p["wm"], p["scale"], p["shift"]
    Kp, Np = wm.shape
    assert K <= Kp

    if M <= 256:
        TM = _round_up(max(M, 16), 16)
        Mp = TM
    else:
        TM = 256
        Mp = _round_up(M, TM)
    TN = _pick_tile(Np)
    TK = _pick_tile(Kp)

    a_p = jnp.pad(a.astype(jnp.bfloat16), ((0, Mp - M), (0, Kp - K)))
    grid = (Mp // TM, Np // TN, Kp // TK)

    out = pl.pallas_call(
        _MM_KERNELS[act],
        out_shape=jax.ShapeDtypeStruct((Mp, Np), jnp.float32),
        grid_spec=pltpu.PrefetchScalarGridSpec(
            num_scalar_prefetch=0,
            grid=grid,
            in_specs=[
                pl.BlockSpec((TM, TK), lambda i, j, k: (i, k)),
                pl.BlockSpec((TK, TN), lambda i, j, k: (k, j)),
                pl.BlockSpec((1, TN), lambda i, j, k: (0, j)),
                pl.BlockSpec((1, TN), lambda i, j, k: (0, j)),
            ],
            out_specs=pl.BlockSpec((TM, TN), lambda i, j, k: (i, j)),
            scratch_shapes=[pltpu.VMEM((TM, TN), jnp.float32)],
        ),
        compiler_params=pltpu.CompilerParams(
            dimension_semantics=("parallel", "parallel", "arbitrary")),
    )(a_p, wm, s_p, t_p)
    return out[:M, :p["cout"]]


# ----------------------------------------------------------------------------
# Pallas kernel 2: fused MCCM tail (row-tiled)
#   w = au*f; x1+=w; x2+=w; g = x1*p + x2*(1-p); g = BN(g);
#   out = softmax_C(g) * x
# ----------------------------------------------------------------------------
def _mccm_tail_kernel(f_ref, x1_ref, x2_ref, x_ref, au_ref,
                      p_ref, s_ref, t_ref, o_ref):
    f = f_ref[...]                       # (1, TR, C)
    w = au_ref[...] * f                  # (1, 1, C) broadcast over rows
    a1 = w + x1_ref[...]
    a2 = w + x2_ref[...]
    p = p_ref[...]
    g = a1 * p + a2 * (1.0 - p)
    g = g * s_ref[...] + t_ref[...]
    m = jnp.max(g, axis=-1, keepdims=True)
    e = jnp.exp(g - m)
    inv = pl.reciprocal(jnp.sum(e, axis=-1, keepdims=True), approx=True)
    o_ref[...] = (e * inv) * x_ref[...]


def mccm_tail(f, x1, x2, x_in, au, param_sig, bn_scale, bn_shift):
    """au: (B, C) SE gate (broadcast inside the kernel)."""
    B, H, W, C = f.shape
    HW = H * W
    if HW <= 512:
        TR = _round_up(HW, 8)
        HWp = TR
    else:
        TR = 512
        HWp = _round_up(HW, TR)

    def shaped(a):
        return jnp.pad(a.reshape(B, HW, C), ((0, 0), (0, HWp - HW), (0, 0)))

    grid = (B, HWp // TR)
    row_spec = pl.BlockSpec((1, TR, C), lambda b, r: (b, r, 0))
    out = pl.pallas_call(
        _mccm_tail_kernel,
        out_shape=jax.ShapeDtypeStruct((B, HWp, C), jnp.float32),
        grid_spec=pltpu.PrefetchScalarGridSpec(
            num_scalar_prefetch=0,
            grid=grid,
            in_specs=[
                row_spec, row_spec, row_spec, row_spec,           # f, x1, x2, x
                pl.BlockSpec((1, 1, C), lambda b, r: (b, 0, 0)),  # au (per batch)
                pl.BlockSpec((1, 1, C), lambda b, r: (0, 0, 0)),  # sigmoid(param)
                pl.BlockSpec((1, 1, C), lambda b, r: (0, 0, 0)),  # bn scale
                pl.BlockSpec((1, 1, C), lambda b, r: (0, 0, 0)),  # bn shift
            ],
            out_specs=row_spec,
        ),
        compiler_params=pltpu.CompilerParams(
            dimension_semantics=("parallel", "parallel")),
    )(shaped(f), shaped(x1), shaped(x2), shaped(x_in),
      au.reshape(B, 1, C).astype(jnp.float32),
      param_sig.reshape(1, 1, C), bn_scale.reshape(1, 1, C),
      bn_shift.reshape(1, 1, C))
    return out[:, :HW, :].reshape(B, H, W, C)


# ----------------------------------------------------------------------------
# Pallas kernel 3: fused channel-softmax + residual:  out = softmax_C(z)*r + r
# (row-tiled)
# ----------------------------------------------------------------------------
def _softmax_res_kernel(z_ref, r_ref, o_ref):
    z = z_ref[...]
    m = jnp.max(z, axis=-1, keepdims=True)
    e = jnp.exp(z - m)
    inv = pl.reciprocal(jnp.sum(e, axis=-1, keepdims=True), approx=True)
    r = r_ref[...]
    o_ref[...] = (e * inv) * r + r


def softmax_residual(z, r):
    B, H, W, C = z.shape
    M = B * H * W
    if M <= 512:
        TR = _round_up(M, 8)
        Mp = TR
    else:
        TR = 512
        Mp = _round_up(M, TR)
    zf = jnp.pad(z.reshape(M, C), ((0, Mp - M), (0, 0)))
    rf = jnp.pad(r.reshape(M, C), ((0, Mp - M), (0, 0)))
    out = pl.pallas_call(
        _softmax_res_kernel,
        out_shape=jax.ShapeDtypeStruct((Mp, C), jnp.float32),
        grid_spec=pltpu.PrefetchScalarGridSpec(
            num_scalar_prefetch=0,
            grid=(Mp // TR,),
            in_specs=[pl.BlockSpec((TR, C), lambda i: (i, 0)),
                      pl.BlockSpec((TR, C), lambda i: (i, 0))],
            out_specs=pl.BlockSpec((TR, C), lambda i: (i, 0)),
        ),
        compiler_params=pltpu.CompilerParams(
            dimension_semantics=("parallel",)),
    )(zf, rf)
    return out[:M].reshape(B, H, W, C)


# ----------------------------------------------------------------------------
# Convolution = (im2col glue | pure reshape for 1x1) + Pallas GEMM
# ----------------------------------------------------------------------------
def conv2d(x, p, act):
    """x:(B,H,W,Cin), stride 1, prepped params p."""
    B, H, W, Cin = x.shape
    kh, kw = p["kh"], p["kw"]
    ph, pw = p["pad"]
    if kh == 1 and kw == 1:
        Ho, Wo = H, W
        a = x.reshape(B * H * W, Cin)
    else:
        xp = jnp.pad(x, ((0, 0), (ph, ph), (pw, pw), (0, 0)))
        Ho = H + 2 * ph - kh + 1
        Wo = W + 2 * pw - kw + 1
        cols = [xp[:, i:i + Ho, j:j + Wo, :] for i in range(kh) for j in range(kw)]
        a = jnp.concatenate(cols, axis=-1).reshape(B * Ho * Wo, kh * kw * Cin)
    out = pallas_matmul_prepped(a, p, act)
    return out.reshape(B, Ho, Wo, p["cout"])


def basic_conv(p, x):           # conv(bias=False) + BN + ReLU
    return conv2d(x, p, "relu")


def plain_conv(p, x):           # nn.Conv2d with bias, no BN/activation
    return conv2d(x, p, "none")


# ----------------------------------------------------------------------------
# Resize helpers (glue)
# ----------------------------------------------------------------------------
def bilinear_scale(x, factor):
    B, H, W, C = x.shape
    nh, nw = max(int(H * factor), 1), max(int(W * factor), 1)
    return jax.image.resize(x, (B, nh, nw, C), method="bilinear")


def resize_to(x, hw):
    B, _, _, C = x.shape
    return jax.image.resize(x, (B, hw[0], hw[1], C), method="bilinear")


# ----------------------------------------------------------------------------
# Deterministic parameter initialization (weights pre-padded/cast once)
# ----------------------------------------------------------------------------
class PRNG:
    def __init__(self, seed):
        self.key = jax.random.PRNGKey(seed)

    def _next(self):
        self.key, k = jax.random.split(self.key)
        return k

    def normal(self, shape, std):
        return std * jax.random.normal(self._next(), shape, jnp.float32)

    def uniform(self, shape):
        return jax.random.uniform(self._next(), shape, jnp.float32)


def _bn_fold(c):
    # eval-mode BN with gamma=1, beta=0, running_mean=0, running_var=1
    scale = jnp.full((c,), 1.0 / jnp.sqrt(1.0 + _BN_EPS), jnp.float32)
    shift = jnp.zeros((c,), jnp.float32)
    return scale, shift


def _prep_conv(w, scale, shift, pad):
    kh, kw, cin, cout = w.shape
    K = kh * kw * cin
    Kp = _round_up(K, 128)
    Np = _round_up(cout, 128)
    wm = jnp.pad(w.reshape(K, cout),
                 ((0, Kp - K), (0, Np - cout))).astype(jnp.bfloat16)
    s_p = jnp.pad(scale.reshape(1, cout).astype(jnp.float32),
                  ((0, 0), (0, Np - cout)))
    t_p = jnp.pad(shift.reshape(1, cout).astype(jnp.float32),
                  ((0, 0), (0, Np - cout)))
    return {"wm": wm, "scale": s_p, "shift": t_p, "pad": pad,
            "kh": kh, "kw": kw, "cin": cin, "cout": cout}


def init_basic_conv(pg, cin, cout, kh, kw, pad):
    std = (2.0 / (kh * kw * cin)) ** 0.5
    scale, shift = _bn_fold(cout)
    return _prep_conv(pg.normal((kh, kw, cin, cout), std), scale, shift, pad)


def init_plain_conv(pg, cin, cout, kh, kw, pad, bias=True):
    std = (2.0 / (kh * kw * cin)) ** 0.5
    shift = pg.normal((cout,), 0.01) if bias else jnp.zeros((cout,), jnp.float32)
    return _prep_conv(pg.normal((kh, kw, cin, cout), std),
                      jnp.ones((cout,), jnp.float32), shift, pad)


def init_mccm(pg, c):
    r = max(c // 16, 1)
    bn_scale, bn_shift = _bn_fold(c)
    return {
        "c13": init_basic_conv(pg, c, c, 1, 3, (0, 1)),
        "c31": init_basic_conv(pg, c, c, 3, 1, (1, 0)),
        "c13_2": init_basic_conv(pg, c, c, 1, 3, (0, 1)),
        "c31_2": init_basic_conv(pg, c, c, 3, 1, (1, 0)),
        "fuseconv": init_basic_conv(pg, 2 * c, c, 3, 3, (1, 1)),
        "aux": {"w1": pg.normal((c, r), (2.0 / c) ** 0.5),
                "b1": jnp.zeros((r,), jnp.float32),
                "w2": pg.normal((r, c), (2.0 / r) ** 0.5),
                "b2": jnp.zeros((c,), jnp.float32)},
        "bn1_scale": bn_scale, "bn1_shift": bn_shift,
        "param": pg.uniform((c,)),
    }


def init_fusion(pg, c):
    return {"ar": init_mccm(pg, c),
            "er": {"conv": init_basic_conv(pg, 2 * c, c, 3, 3, (1, 1))}}


def init_fm(pg, inc):
    half = inc // 2
    return {"con2": init_plain_conv(pg, inc, half, 1, 1, (0, 0)),
            "fun": init_fusion(pg, half),
            "con3": init_basic_conv(pg, half, inc, 1, 1, (0, 0))}


def init_fm2(pg, inc):
    p = init_fm(pg, inc)
    p["con5"] = init_plain_conv(pg, 192, inc // 2, 1, 1, (0, 0))
    return p


def init_aa(pg, inc=192):
    return {
        "fuse1": init_fusion(pg, 96),
        "fuse2": init_fm(pg, 192),
        "fuse3": init_fm2(pg, 288),
        "fuse4": init_fm(pg, 576),  # FM3 is structurally identical to FM
        "Conv43": [init_basic_conv(pg, 864, inc, 1, 1, (0, 0)),
                   init_basic_conv(pg, inc, inc, 3, 3, (1, 1))],
        "Conv432": [init_basic_conv(pg, inc * 2, inc, 1, 1, (0, 0)),
                    init_basic_conv(pg, inc, inc, 3, 3, (1, 1))],
        "Conv4321": [init_basic_conv(pg, 288, inc, 1, 1, (0, 0)),
                     init_basic_conv(pg, inc, inc, 3, 3, (1, 1))],
        "sal_pred": {"c1": init_basic_conv(pg, inc, 96, 3, 3, (1, 1)),
                     "c2": init_plain_conv(pg, 96, 1, 3, 3, (1, 1), bias=False)},
        "linear2": init_plain_conv(pg, 576, 1, 3, 3, (1, 1)),
        "linear3": init_plain_conv(pg, inc, 1, 3, 3, (1, 1)),
        "linear4": init_plain_conv(pg, inc, 1, 3, 3, (1, 1)),
        # aspp_rgb / aspp_depth / tu(GBF) / co are created in __init__ but are
        # never used in AA.forward, so no parameters are materialized for them.
    }


# ----------------------------------------------------------------------------
# Forward passes
# ----------------------------------------------------------------------------
def filter_layer_forward(p, y):
    # SE-style channel gate: GAP -> FC -> ReLU -> FC -> sigmoid -> (B, C)
    # Tiny (1xC @ Cxr) matmuls: keep in plain JAX (padding them to MXU tiles
    # would be >99% wasted work).
    g = jnp.mean(y, axis=(1, 2))
    h = jax.nn.relu(g @ p["w1"] + p["b1"])
    s = h @ p["w2"] + p["b2"]
    return jax.nn.sigmoid(s)


def mccm_forward(p, x, y):
    x1 = basic_conv(p["c13"], x)
    x1 = basic_conv(p["c31"], x1)
    x2 = basic_conv(p["c31_2"], x)
    x2 = basic_conv(p["c13_2"], x2)
    f = jnp.concatenate([x1, x2], axis=-1)
    f = basic_conv(p["fuseconv"], f)
    au = filter_layer_forward(p["aux"], y)          # (B, C)
    return mccm_tail(f, x1, x2, x, au,
                     jax.nn.sigmoid(p["param"]),
                     p["bn1_scale"], p["bn1_shift"])


def dffm_forward(p, a, b):
    # TODO(synk): DFFM source not provided; approximated as concat + 3x3 BasicConv2d.
    return basic_conv(p["conv"], jnp.concatenate([a, b], axis=-1))


def fusion_forward(p, r, d):
    B = r.shape[0]
    # Both MCCM branches share weights (self.ar) -> batch them along B.
    x_cat = jnp.concatenate([r, d], axis=0)
    y_cat = jnp.concatenate([d, r], axis=0)
    b_cat = mccm_forward(p["ar"], x_cat, y_cat)
    sr = softmax_residual(b_cat, x_cat)   # softmax_C(b)*x + x, batched
    br, bd = sr[:B], sr[B:]
    out = dffm_forward(p["er"], br, bd)
    return out                            # Dropout(0.1) -> identity at eval


def fm_forward(p, r, d, s):
    B = r.shape[0]
    rd = plain_conv(p["con2"], jnp.concatenate([r, d], axis=0))  # shared weights
    s = bilinear_scale(s, 0.5)
    r = rd[:B] + s
    d = rd[B:] + s
    s = fusion_forward(p["fun"], r, d)
    return basic_conv(p["con3"], s)


def fm2_forward(p, r, d, s):
    B = r.shape[0]
    rd = plain_conv(p["con2"], jnp.concatenate([r, d], axis=0))
    s = bilinear_scale(s, 0.5)
    s = plain_conv(p["con5"], s)
    r = rd[:B] + s
    d = rd[B:] + s
    s = fusion_forward(p["fun"], r, d)
    return basic_conv(p["con3"], s)


def aa_forward(params, x_nchw, feature_list_nchw):
    x = jnp.transpose(x_nchw, (0, 2, 3, 1)).astype(jnp.float32)
    feats = [jnp.transpose(f, (0, 2, 3, 1)).astype(jnp.float32)
             for f in feature_list_nchw]
    # cat((f,f),1).view(b,2,c,h,w).permute(1,0,...).unbind(0) -> (R, D) == (f, f)
    R1, D1 = feats[0], feats[0]
    R2, D2 = feats[1], feats[1]
    R3, D3 = feats[2], feats[2]
    R4, D4 = feats[3], feats[3]

    f1 = fusion_forward(params["fuse1"], R1, D1)
    f2 = fm_forward(params["fuse2"], R2, D2, f1)
    f3 = fm2_forward(params["fuse3"], R3, D3, f2)
    f4 = fm_forward(params["fuse4"], R4, D4, f3)     # FM3 == FM structurally

    F3 = bilinear_scale(f4, 2.0)
    F3 = jnp.concatenate([F3, f3], axis=-1)
    F3 = basic_conv(params["Conv43"][0], F3)
    F3 = basic_conv(params["Conv43"][1], F3)

    F2 = bilinear_scale(F3, 2.0)
    F2 = jnp.concatenate([F2, f2], axis=-1)
    F2 = basic_conv(params["Conv432"][0], F2)
    F2 = basic_conv(params["Conv432"][1], F2)

    F1 = bilinear_scale(F2, 2.0)
    F1 = jnp.concatenate([F1, f1], axis=-1)
    F1 = basic_conv(params["Conv4321"][0], F1)
    F1 = basic_conv(params["Conv4321"][1], F1)

    smap = basic_conv(params["sal_pred"]["c1"], F1)
    smap = plain_conv(params["sal_pred"]["c2"], smap)

    hw = x.shape[1:3]
    T4 = resize_to(plain_conv(params["linear2"], f4), hw)
    T3 = resize_to(plain_conv(params["linear3"], F3), hw)
    T2 = resize_to(plain_conv(params["linear4"], F2), hw)
    T1 = bilinear_scale(smap, 4.0)

    to_nchw = lambda a: jnp.transpose(a, (0, 3, 1, 2))
    return tuple(to_nchw(t) for t in
                 (T1, T2, T3, T4, f1, f2, f3, f4, F3, F2, F1))


# ----------------------------------------------------------------------------
if __name__ == "__main__":
    pg = PRNG(0)
    params = init_aa(pg, inc=192)

    key = jax.random.PRNGKey(0)
    k1, k2, k3, k4, k5 = jax.random.split(key, 5)
    B, H1 = 1, 16
    x = jax.random.normal(k1, (B, 3, 4 * H1, 4 * H1), jnp.float32)
    feature_list = [
        jax.random.normal(k2, (B, 96, H1, H1), jnp.float32),
        jax.random.normal(k3, (B, 192, H1 // 2, H1 // 2), jnp.float32),
        jax.random.normal(k4, (B, 288, H1 // 4, H1 // 4), jnp.float32),
        jax.random.normal(k5, (B, 576, H1 // 8, H1 // 8), jnp.float32),
    ]

    outs = aa_forward(params, x, feature_list)
    outs = jax.block_until_ready(outs)
    assert len(outs) == 11
    print("KERNEL_OK")
</pallas_src>

<mosaic_0001>
module attributes {stable_mosaic.version = 11 : i64} {
  func.func @kernel(%arg0: i32, %arg1: i32, %arg2: i32, %arg3: memref<256x384xbf16, #tpu.memory_space<vmem>>, %arg4: memref<384x128xbf16, #tpu.memory_space<vmem>>, %arg5: memref<1x128xf32, #tpu.memory_space<vmem>>, %arg6: memref<1x128xf32, #tpu.memory_space<vmem>>, %arg7: memref<256x128xf32, #tpu.memory_space<vmem>>, %arg8: memref<256x128xf32, #tpu.memory_space<vmem>>) attributes {dimension_semantics = [#tpu.dimension_semantics<parallel>, #tpu.dimension_semantics<parallel>, #tpu.dimension_semantics<arbitrary>], iteration_bounds = array<i64: 2, 1, 1>, scalar_prefetch = 0 : i64, scratch_operands = 1 : i64, tpu.core_type = #tpu.core_type<tc>, window_params = [{transform_indices = @transform_0, window_bounds = array<i64: 256, 384>}, {transform_indices = @transform_1, window_bounds = array<i64: 384, 128>}, {transform_indices = @transform_2, window_bounds = array<i64: 1, 128>}, {transform_indices = @transform_3, window_bounds = array<i64: 1, 128>}, {transform_indices = @transform_4, window_bounds = array<i64: 256, 128>}]} {
    %c0_i32 = arith.constant 0 : i32
    %0 = arith.cmpi eq, %arg2, %c0_i32 : i32
    %1 = arith.extui %0 : i1 to i32
    %c0_i32_0 = arith.constant 0 : i32
    %2 = arith.cmpi ne, %1, %c0_i32_0 : i32
    scf.if %2 {
      %cst_10 = arith.constant 0.000000e+00 : f32
      %12 = vector.broadcast %cst_10 : f32 to vector<256x128xf32>
      %c0_11 = arith.constant 0 : index
      %c0_12 = arith.constant 0 : index
      %13 = vector.load %arg8[%c0_11, %c0_12] : memref<256x128xf32, #tpu.memory_space<vmem>>, vector<256x128xf32>
      tpu.vector_store %arg8[%c0_11, %c0_12], %12 {strides = array<i32>} : memref<256x128xf32, #tpu.memory_space<vmem>>, vector<256x128xf32>,
    } else {
    }
    %c0 = arith.constant 0 : index
    %c0_1 = arith.constant 0 : index
    %3 = vector.load %arg8[%c0, %c0_1] : memref<256x128xf32, #tpu.memory_space<vmem>>, vector<256x128xf32>
    %c0_2 = arith.constant 0 : index
    %c0_3 = arith.constant 0 : index
    %4 = vector.load %arg3[%c0_2, %c0_3] : memref<256x384xbf16, #tpu.memory_space<vmem>>, vector<256x384xbf16>
    %c0_4 = arith.constant 0 : index
    %c0_5 = arith.constant 0 : index
    %5 = vector.load %arg4[%c0_4, %c0_5] : memref<384x128xbf16, #tpu.memory_space<vmem>>, vector<384x128xbf16>
    %cst = arith.constant dense<0.000000e+00> : vector<256x128xf32>
    %6 = tpu.matmul %4, %5, %cst {dimension_numbers = #tpu.dot_dimension_numbers<[1], [0], [0], [1], [0, 0, 1, 1], [], []>} : vector<256x384xbf16>, vector<384x128xbf16>, vector<256x128xf32> -> vector<256x128xf32>
    %7 = arith.addf %3, %6 : vector<256x128xf32>
    %c0_6 = arith.constant 0 : index
    %c0_7 = arith.constant 0 : index
    %8 = vector.load %arg8[%c0_6, %c0_7] : memref<256x128xf32, #tpu.memory_space<vmem>>, vector<256x128xf32>
    tpu.vector_store %arg8[%c0_6, %c0_7], %7 {strides = array<i32>} : memref<256x128xf32, #tpu.memory_space<vmem>>, vector<256x128xf32>,
    %c0_i32_8 = arith.constant 0 : i32
    %9 = arith.cmpi eq, %arg2, %c0_i32_8 : i32
    %10 = arith.extui %9 : i1 to i32
    %c0_i32_9 = arith.constant 0 : i32
    %11 = arith.cmpi ne, %10, %c0_i32_9 : i32
    scf.if %11 {
      %c0_10 = arith.constant 0 : index
      %c0_11 = arith.constant 0 : index
      %12 = vector.load %arg8[%c0_10, %c0_11] : memref<256x128xf32, #tpu.memory_space<vmem>>, vector<256x128xf32>
      %c0_12 = arith.constant 0 : index
      %c0_13 = arith.constant 0 : index
      %13 = vector.load %arg5[%c0_12, %c0_13] : memref<1x128xf32, #tpu.memory_space<vmem>>, vector<1x128xf32>
      %14 = vector.broadcast %13 : vector<1x128xf32> to vector<256x128xf32>
      %15 = arith.mulf %12, %14 : vector<256x128xf32>
      %c0_14 = arith.constant 0 : index
      %c0_15 = arith.constant 0 : index
      %16 = vector.load %arg6[%c0_14, %c0_15] : memref<1x128xf32, #tpu.memory_space<vmem>>, vector<1x128xf32>
      %17 = vector.broadcast %16 : vector<1x128xf32> to vector<256x128xf32>
      %18 = arith.addf %15, %17 : vector<256x128xf32>
      %cst_16 = arith.constant 0.000000e+00 : f32
      %19 = vector.broadcast %cst_16 : f32 to vector<256x128xf32>
      %20 = arith.maximumf %18, %19 : vector<256x128xf32>
      %c0_17 = arith.constant 0 : index
      %c0_18 = arith.constant 0 : index
      %21 = vector.load %arg7[%c0_17, %c0_18] : memref<256x128xf32, #tpu.memory_space<vmem>>, vector<256x128xf32>
      tpu.vector_store %arg7[%c0_17, %c0_18], %20 {strides = array<i32>} : memref<256x128xf32, #tpu.memory_space<vmem>>, vector<256x128xf32>,
    } else {
    }
    return
  }
  func.func @transform_0(%arg0: i32, %arg1: i32, %arg2: i32) -> (i32, i32) {
    %c0_i32 = arith.constant 0 : i32
    return %arg0, %arg2 : i32, i32
  }
  func.func @transform_1(%arg0: i32, %arg1: i32, %arg2: i32) -> (i32, i32) {
    %c0_i32 = arith.constant 0 : i32
    return %arg2, %arg1 : i32, i32
  }
  func.func @transform_2(%arg0: i32, %arg1: i32, %arg2: i32) -> (i32, i32) {
    %c0_i32 = arith.constant 0 : i32
    %c0_i32_0 = arith.constant 0 : i32
    return %c0_i32, %arg1 : i32, i32
  }
  func.func @transform_3(%arg0: i32, %arg1: i32, %arg2: i32) -> (i32, i32) {
    %c0_i32 = arith.constant 0 : i32
    %c0_i32_0 = arith.constant 0 : i32
    return %c0_i32, %arg1 : i32, i32
  }
  func.func @transform_4(%arg0: i32, %arg1: i32, %arg2: i32) -> (i32, i32) {
    %c0_i32 = arith.constant 0 : i32
    return %arg0, %arg1 : i32, i32
  }
}

</mosaic_0001>

<bundles_post_ra>
// kernel: tpu_custom_call.1
= control target key start
LH: loop header
LB: loop body
LE: loop exit
PB: predicated region body
PF: predicated region fallthrough
CT: control target
= control target key end

     0   :  { %9 = vsyncpa [#allocation4], 0  ;;  %s2597_s0 = inlined_call_operand.hbm [shape: bf16[512,384], index: 0, kind: input, shape index: {}]   ;;  %s2598_s1 = inlined_call_operand.hbm [shape: bf16[384,128], index: 1, kind: input, shape index: {}]   ;;  %s2599_s2 = inlined_call_operand.vmem [shape: f32[1,128], index: 2, kind: input, shape index: {}]   ;;  %s2600_s3 = inlined_call_operand.vmem [shape: f32[1,128], index: 3, kind: input, shape index: {}]   ;;  %s2601_s4 = inlined_call_operand.hbm [shape: f32[512,128], index: 4, kind: output, shape index: {}]  }
   0x1   :  { %11 = vsyncpa [#allocation4 + $0x1], 0 }
   0x2   :  { %12 = vsyncpa [#allocation7], 0 }
   0x3   :  { %13 = vsyncpa [#allocation5], 0 }
   0x4   :  { %15 = vsyncpa [#allocation5 + $0x1], 0  ;;  %s2223_s15 = smov 0   ;;  %s2225_s16 = smov 0  }
   0x5   :  { %s2227_s17 = smov 0   ;;  %s2229_s18 = smov 0  }
   0x6   :  { %s2231_s19 = smov 0   ;;  %s2233_s20 = smov 0  }
   0x7 LB: > { %s1586_s21 = sadd.s32 4294967295, %s2187_s20   ;;  %s1587_s22 = sadd.s32 4294967294, %s2187_s20   ;;  %s2187_s20 = sphi %s2233_s20, %s21_s20   ;;  %s2183_s19 = sphi %s2231_s19, %s2617_s19   ;;  %s2179_s18 = sphi %s2229_s18, %s2616_s18   ;;  %s2175_s17 = sphi %s2227_s17, %s2615_s17   ;;  %s2171_s16 = sphi %s2225_s16, %s2614_s16   ;;  %s2167_s15 = sphi %s2223_s15, %s2613_s15  }
   0x8   : > { %p62_p0 = scmp.ne.s32.totalorder %s2171_s16, %s2167_s15  ;;  %p2257_p1 = scmp.eq.s32.totalorder %s1586_s21, 0 }
   0x9   : > { %p2261_p2 = scmp.eq.s32.totalorder %s1586_s21, 1  ;;  %p174_p3 = scmp.eq.s32.totalorder %s1587_s22, 1 }
   0xa   : > { %p2267_p4 = por %p2257_p1, %p62_p0  ;;  %p1588_p5 = scmp.ge.s32.totalorder %s2187_s20, 1 }
   0xb   : > { %p2272_p6 = por %p174_p3, %p62_p0  ;;  %p181_p7 = scmp.lt.s32.totalorder %s2187_s20, 3 }
   0xc   : > { %s2605_s25 = scalar_select %p2267_p4, 1, 0 }
   0xd   : > { %s2606_s26 = scalar_select %p2272_p6, 1, 0 }
   0xe   : > { %p2277_p8 = pnand %p1588_p5, %p181_p7  ;;  %s2189_s28 = smov [#allocation6]  }
   0xf   : > { %s197_s29 = sshll.u32 %s2189_s28, 4  ;;  %p1592_p10 = scmp.ge.s32.totalorder %s2187_s20, 2  ;;  %s198_s29 = int_to_ptr.vmem [resolvable:$true] %s197_s29 }
  0x10   : > { %p1890_p9 = pneg %p2277_p8  ;;  %s40_s5 = sadd.s32 1, %s2183_s19 }
  0x11   : > { %s2060_s6 = scalar_lea.vmem %s198_s29, 3072  ;;  %p2068_p5 = scmp.lt.s32.totalorder %s198_s29, %s198_s29 }
  0x12   : > { %p2286_p11 = pnand %p1890_p9, %p2257_p1  ;;  %p2061_p13 = scmp.ne.s32.totalorder %s198_s29, %s2060_s6 }
  0x13   : > { %p2069_p7 = scmp.lt.s32.totalorder %s2060_s6, %s2060_s6 }
  0x14   : > { %p2051_p12 = pneg %p2286_p11 }
  0x15   : > { %p2070_p6 = por %p2069_p7, %p2068_p5 }
  0x16   : > { %p2063_p0 = pnand %p2061_p13, %p2051_p12 }
  0x18   : > { %p2064_p3 = pneg %p2063_p0 }
  0x1a   : > { %p2071_p4 = pnand %p2070_p6, %p2064_p3 }
  0x1c   : > { %2074 = shalt.err (!%p2071_p4)
}
  0x1d   : > { %s2190_s7 = smov 64   ;;  %s2191_s8 = smov 4  }
  0x1e   : > { %1893 = dma.hbm_to_vmem [thread:$0]  (!%p2286_p11), %s2598_s1, 3072, %s198_s29, [#allocation7], %s2190_s7, %s2190_s7, %s2191_s8  }
  0x1f   : > { %p42_p6 = scmp.ge.s32.totalorder %s40_s5, 2  ;;  %s49_s11 = sadd.s32 1, %s2175_s17 }
  0x20   : > { %p56_p4 = scmp.ne.s32.totalorder %s2175_s17, %s2171_s16  ;;  %p57_p9 = scmp.eq.s32.totalorder %s2187_s20, 0 }
  0x21   : > { %s2619_s5 = smov (%p42_p6, %s40_s5), 0  ;;  %p1903_p0 = scmp.lt.s32.totalorder %s2187_s20, 2 }
  0x22   : > { %p58_p12 = por %p57_p9, %p56_p4  ;;  %p2306_p13 = por %p2261_p2, %p56_p4 }
  0x23   : > { %s44_s13 = ssub.s32 %s2183_s19, %s2619_s5  ;;  %s223_s14 = sand.u32 1, %s2175_s17  }
  0x24   : > { %p47_p3 = scmp.eq.s32.totalorder %s44_s13, 0  ;;  %s1879_s21 = smul.u32 384, %s223_s14 }
  0x25   : > { %s1880_s28 = smul.u32 6144, %s2183_s19  ;;  %p2318_p11 = pnand %p1903_p0, %p58_p12 }
  0x26   : > { %s2315_s22 = scalar_select %p47_p3, %s2175_s17, %s49_s11  }
  0x27   : > { %s227_s29 = scalar_lea.vmem [#allocation3], %s1879_s21  ;;  %s236_s8 = scalar_lea.hbm %s2597_s0, %s1880_s28 }
  0x28   : > { %s237_s30 = sshll.u32 %s227_s29, 4  ;;  %s224_s9 = scalar_lea.sflag [#allocation4], %s223_s14  ;;  %s238_s30 = int_to_ptr.vmem [resolvable:$true] %s237_s30 }
  0x29   : > { %p2077_p2 = pneg %p2318_p11  ;;  %s2088_s10 = scalar_lea.vmem %s238_s30, 6144 }
  0x2a   : > { %p2089_p5 = scmp.ne.s32.totalorder %s238_s30, %s2088_s10  ;;  %s2192_s11 = smov [#allocation3]  }
  0x2b   : > { %s2093_s13 = sshll.u32 %s2192_s11, 4  ;;  %s2094_s13 = int_to_ptr.vmem [resolvable:$false] %s2093_s13 }
  0x2c   : > { %p2091_p7 = pnand %p2089_p5, %p2077_p2  ;;  %s2095_s21 = scalar_lea.vmem %s2094_s13, 12288 }
  0x2d   : > { %p2096_p4 = scmp.lt.s32.totalorder %s238_s30, %s2094_s13  ;;  %p2097_p9 = scmp.lt.s32.totalorder %s2095_s21, %s2088_s10 }
  0x2e   : > { %p2092_p6 = pneg %p2091_p7 }
  0x2f   : > { %p2098_p12 = por %p2097_p9, %p2096_p4 }
  0x31   : > { %p2099_p0 = pnand %p2098_p12, %p2092_p6 }
  0x33   : > { %2102 = shalt.err (!%p2099_p0)
}
  0x34   : > { %s2193_s29 = smov 192   ;;  %s2194_s28 = smov 12  }
  0x35   : > { %1897 = dma.hbm_to_vmem [thread:$0]  (!%p2318_p11), %s236_s8, 6144, %s238_s30, %s224_s9, %s2193_s29, %s2193_s29, %s2194_s28  }
  0x36   : > { %249 = sbr.rel (%p2277_p8) target bundleno = 406 (0x196), region = 36  ;;  %s2332_s14 = sand.u32 (!%p2277_p8), 1, %s2171_s16  }
  0x37   : > { %s1881_s7 = smul.u32 (!%p2277_p8), 384, %s2332_s14  ;;  %s252_s24 = scalar_lea.sflag (!%p2277_p8), [#allocation4], %s2332_s14 }
  0x38   : > { %p2611_p3 = scmp.ne.s32.totalorder (!%p2277_p8), %s2605_s25, 0 }
  0x39   : > { %s2336_s10 = scalar_lea.vmem (!%p2277_p8), [#allocation3], %s1881_s7 }
  0x3b   : > { %2154 = dma.done.wait (%p2611_p3), %s252_s24, 6144  }
  0x3c   : > { %2156 = vsyncadd (%p2611_p3), %s252_s24, 4294961152 }
  0x3d   : > { %2158 = dma.done.wait (%p2257_p1), [#allocation7], 3072  }
  0x3e   : > { %2160 = vsyncadd (%p2257_p1), [#allocation7], 4294964224  ;;  %v1961_v0 = vld [vmem:[#allocation6 + $0x78] sm:$0xff]   ;;  %v1963_v2 = vld [vmem:[#allocation6 + $0x70] sm:$0xff]   ;;  %s1598_s6 = sshll.u32 %s2332_s14, 8  ;;  %s1678_s9 = sshll.u32 %s2179_s18, 12 }
  0x3f   : > { %v1962_v1 = vld [vmem:[#allocation6 + $0x38] sm:$0xff]   ;;  %1679 = vmatprep.subr.bf16.mxu0 %v1961_v0  ;;  %1863 = vmatprep.subr.bf16.mxu1 %v1961_v0  ;;  %v1964_v3 = vld [vmem:[#allocation6 + $0x30] sm:$0xff]   ;;  %v1965_v4 = vld [vmem:[#allocation6 + $0x68] sm:$0xff]   ;;  %s2432_s8 = scalar_lea.vmem [#allocation8], %s1598_s6  ;;  %s2545_s29 = scalar_lea.hbm %s2601_s4, %s1678_s9 }
  0x40   : > { %1680 = vmatpush3.bf16.msra.mxu0 %v1962_v1  ;;  %1871 = vmatpush3.bf16.msra.mxu1 %v1962_v1  ;;  %v1966_v5 = vld [vmem:[#allocation6 + $0x28] sm:$0xff]   ;;  %v1967_v6 = vld [vmem:[#allocation6 + $0x60] sm:$0xff]   ;;  %v1969_v8 = vld [vmem:[#allocation6 + $0x58] sm:$0xff]   ;;  %s1459_s11 = sshll.u32 %s2432_s8, 4  ;;  %s1445_s18 = scalar_lea.sflag [#allocation5], %s2332_s14  ;;  %s2547_s11 = int_to_ptr.vmem [resolvable:$true] %s1459_s11 }
  0x41   : > { %1681 = vmatprep.subr.bf16.mxu0 %v1963_v2  ;;  %1864 = vmatprep.subr.bf16.mxu1 %v1963_v2  ;;  %v1968_v7 = vld [vmem:[#allocation6 + $0x20] sm:$0xff]   ;;  %v1970_v9 = vld [vmem:[#allocation6 + $0x18] sm:$0xff]   ;;  %v1971_v10 = vld [vmem:[#allocation6 + $0x50] sm:$0xff]   ;;  %s2103_s28 = scalar_lea.vmem %s2547_s11, 4096  ;;  %s2195_s7 = smov [#allocation8]  }
  0x42   : > { %v1979_v11 = vld [vmem:[%s2336_s10 + $0x4] ss:$12 sps:$4 sm:$0xff]   ;;  %v1973_v14 = vld [vmem:[#allocation6 + $0x48] sm:$0xff]   ;;  %v1983_v18 = vld [vmem:[#allocation6 + $0xb8] sm:$0xff]   ;;  %p2104_p1 = scmp.ne.s32.totalorder %s2547_s11, %s2103_s28  ;;  %s2107_s24 = sshll.u32 %s2195_s7, 4  ;;  %s2108_s24 = int_to_ptr.vmem [resolvable:$false] %s2107_s24 }
  0x43   : > { %v1982_v12 = vld [vmem:[%s2336_s10 + $0x124] ss:$12 sps:$4 sm:$0xff]   ;;  %913 = vmatprep.mubr.bf16.mxu0 %v1979_v11  ;;  %v1974_v15 = vld [vmem:[#allocation6 + $0x8] sm:$0xff]   ;;  %v1993_v28 = vld [vmem:[%s2336_s10 + $0x34] ss:$12 sps:$4 sm:$0xff]   ;;  %p2110_p2 = scmp.lt.s32.totalorder %s2547_s11, %s2108_s24 }
  0x44   : > { %1682 = vmatpush3.bf16.msra.mxu0 %v1964_v3  ;;  %1872 = vmatpush3.bf16.msra.mxu1 %v1964_v3  ;;  %v1972_v13 = vld [vmem:[#allocation6 + $0x10] sm:$0xff]   ;;  %v1975_v16 = vld [vmem:[#allocation6 + $0x40] sm:$0xff]   ;;  %v1985_v21 = vld [vmem:[%s2336_s10 + $0x1c] ss:$12 sps:$4 sm:$0xff]   ;;  %p2105_p8 = pnand %p2104_p1, %p2306_p13 }
  0x45   : > { %1683 = vmatprep.subr.bf16.mxu0 %v1965_v4  ;;  %1865 = vmatprep.subr.bf16.mxu1 %v1965_v4  ;;  %v1976_v17 = vld [vmem:[#allocation6] sm:$0xff]   ;;  %v1984_v22 = vld [vmem:[#allocation6 + $0xb0] sm:$0xff]   ;;  %v1987_v23 = vld [vmem:[%s2336_s10 + $0x13c] ss:$12 sps:$4 sm:$0xff]  }
  0x46   : > { %1009 = vmatprep.mubr.bf16.mxu1 %v1982_v12  ;;  %v1977_v19 = vld [vmem:[%s2336_s10] ss:$12 sps:$4 sm:$0xff]   ;;  %v1989_v24 = vld [vmem:[%s2336_s10 + $0x18] ss:$12 sps:$4 sm:$0xff]   ;;  %v1997_v31 = vld [vmem:[%s2336_s10 + $0x30] ss:$12 sps:$4 sm:$0xff]   ;;  %p2106_p11 = pneg %p2105_p8 }
  0x47   : > { %v1980_v20 = vld [vmem:[%s2336_s10 + $0x120] ss:$12 sps:$4 sm:$0xff]   ;;  %v1990_v26 = vld [vmem:[%s2336_s10 + $0x138] ss:$12 sps:$4 sm:$0xff]   ;;  %v1998_v32 = vld [vmem:[%s2336_s10 + $0x150] ss:$12 sps:$4 sm:$0xff]  }
  0x48   : > { %1684 = vmatpush3.bf16.msra.mxu0 %v1966_v5  ;;  %1873 = vmatpush3.bf16.msra.mxu1 %v1966_v5  ;;  %v1991_v25 = vld [vmem:[#allocation6 + $0xa8] sm:$0xff]   ;;  %v1992_v27 = vld [vmem:[#allocation6 + $0xa0] sm:$0xff]   ;;  %v1999_v30 = vld [vmem:[#allocation6 + $0x98] sm:$0xff]  }
  0x49   : > { %1685 = vmatprep.subr.bf16.mxu0 %v1967_v6  ;;  %1866 = vmatprep.subr.bf16.mxu1 %v1967_v6  ;;  %v1995_v29 = vld [vmem:[%s2336_s10 + $0x154] ss:$12 sps:$4 sm:$0xff]   ;;  %v2001_v34 = vld [vmem:[%s2336_s10 + $0x4c] ss:$12 sps:$4 sm:$0xff]   ;;  %v2009_v39 = vld [vmem:[%s2336_s10 + $0x64] ss:$12 sps:$4 sm:$0xff]  }
  0x4a   : > { %v2000_v33 = vld [vmem:[#allocation6 + $0x90] sm:$0xff]   ;;  %v2003_v35 = vld [vmem:[%s2336_s10 + $0x16c] ss:$12 sps:$4 sm:$0xff]   ;;  %v2008_v40 = vld [vmem:[#allocation6 + $0x80] sm:$0xff]  }
  0x4b   : > { %v2007_v36 = vld [vmem:[#allocation6 + $0x88] sm:$0xff]   ;;  %v2016_v45 = vld [vmem:[%s2336_s10 + $0x38] ss:$12 sps:$4 sm:$0xff]   ;;  %v2018_v47 = vld [vmem:[%s2336_s10 + $0x50] ss:$12 sps:$4 sm:$0xff]  }
  0x4c   : > { %1686 = vmatpush3.bf16.msra.mxu0 %v1968_v7  ;;  %1874 = vmatpush3.bf16.msra.mxu1 %v1968_v7  ;;  %v2005_v37 = vld [vmem:[%s2336_s10 + $0x48] ss:$12 sps:$4 sm:$0xff]   ;;  %v2012_v42 = vld [vmem:[%s2336_s10 + $0x60] ss:$12 sps:$4 sm:$0xff]   ;;  %v2017_v46 = vld [vmem:[%s2336_s10 + $0x78] ss:$12 sps:$4 sm:$0xff]  }
  0x4d   : > { %1687 = vmatprep.subr.bf16.mxu0 %v1969_v8  ;;  %1867 = vmatprep.subr.bf16.mxu1 %v1969_v8  ;;  %v2006_v38 = vld [vmem:[%s2336_s10 + $0x168] ss:$12 sps:$4 sm:$0xff]   ;;  %v2013_v43 = vld [vmem:[%s2336_s10 + $0x20] ss:$12 sps:$4 sm:$0xff]   ;;  %v2022_v50 = vld [vmem:[%s2336_s10 + $0x90] ss:$12 sps:$4 sm:$0xff]  }
  0x4e   : > { %v2011_v41 = vld [vmem:[%s2336_s10 + $0x8] ss:$12 sps:$4 sm:$0xff]   ;;  %v2023_v51 = vld [vmem:[%s2336_s10 + $0x80] ss:$12 sps:$4 sm:$0xff]   ;;  %v2026_v53 = vld [vmem:[%s2336_s10 + $0x98] ss:$12 sps:$4 sm:$0xff]  }
  0x4f   : > { %v2014_v44 = vld [vmem:[%s2336_s10 + $0x7c] ss:$12 sps:$4 sm:$0xff]   ;;  %v2019_v48 = vld [vmem:[%s2336_s10 + $0x94] ss:$12 sps:$4 sm:$0xff]   ;;  %v2024_v52 = vld [vmem:[%s2336_s10 + $0xac] ss:$12 sps:$4 sm:$0xff]  }
  0x50   : > { %1688 = vmatpush3.bf16.msra.mxu0 %v1970_v9  ;;  %1875 = vmatpush3.bf16.msra.mxu1 %v1970_v9  ;;  %v2021_v49 = vld [vmem:[%s2336_s10 + $0x68] ss:$12 sps:$4 sm:$0xff]   ;;  %v2028_v55 = vld [vmem:[%s2336_s10 + $0xb0] ss:$12 sps:$4 sm:$0xff]   ;;  %v2032_v58 = vld [vmem:[%s2336_s10 + $0xc0] ss:$12 sps:$4 sm:$0xff]  }
  0x51   : > { %1689 = vmatprep.subr.bf16.mxu0 %v1971_v10  ;;  %1868 = vmatprep.subr.bf16.mxu1 %v1971_v10  ;;  %v2027_v54 = vld [vmem:[%s2336_s10 + $0xa8] ss:$12 sps:$4 sm:$0xff]   ;;  %v2029_v56 = vld [vmem:[%s2336_s10 + $0xc4] ss:$12 sps:$4 sm:$0xff]   ;;  %v2033_v59 = vld [vmem:[%s2336_s10 + $0xe0] ss:$12 sps:$4 sm:$0xff]  }
  0x52   : > { %v2031_v57 = vld [vmem:[%s2336_s10 + $0xc8] ss:$12 sps:$4 sm:$0xff]   ;;  %v2036_v61 = vld [vmem:[%s2336_s10 + $0xf8] ss:$12 sps:$4 sm:$0xff]   ;;  %v2038_v63 = vld [vmem:[%s2336_s10 + $0x110] ss:$12 sps:$4 sm:$0xff]  }
  0x53   : > { %v2034_v60 = vld [vmem:[%s2336_s10 + $0xdc] ss:$12 sps:$4 sm:$0xff]   ;;  %v2037_v62 = vld [vmem:[%s2336_s10 + $0xd8] ss:$12 sps:$4 sm:$0xff]   ;;  %v2039_v0 = vld [vmem:[%s2336_s10 + $0xf4] ss:$12 sps:$4 sm:$0xff]  }
  0x54   : > { %1690 = vmatpush3.bf16.msra.mxu0 %v1972_v13  ;;  %1876 = vmatpush3.bf16.msra.mxu1 %v1972_v13  ;;  %v2041_v1 = vld [vmem:[%s2336_s10 + $0x128] ss:$12 sps:$4 sm:$0xff]   ;;  %v2042_v2 = vld [vmem:[%s2336_s10 + $0xf0] ss:$12 sps:$4 sm:$0xff]   ;;  %v2043_v3 = vld [vmem:[%s2336_s10 + $0x140] ss:$12 sps:$4 sm:$0xff]  }
  0x55   : > { %1691 = vmatprep.subr.bf16.mxu0 %v1973_v14  ;;  %1869 = vmatprep.subr.bf16.mxu1 %v1973_v14  ;;  %v2044_v4 = vld [vmem:[%s2336_s10 + $0x10c] ss:$12 sps:$4 sm:$0xff]   ;;  %v2047_v6 = vld [vmem:[%s2336_s10 + $0x108] ss:$12 sps:$4 sm:$0xff]   ;;  %v2048_v7 = vld [vmem:[%s2336_s10 + $0x170] ss:$12 sps:$4 sm:$0xff]  }
  0x56   : > { %v2046_v5 = vld [vmem:[%s2336_s10 + $0x158] ss:$12 sps:$4 sm:$0xff]   ;;  %s2109_s10 = scalar_lea.vmem %s2108_s24, 8192 }
  0x57   : > { %p2111_p5 = scmp.lt.s32.totalorder %s2109_s10, %s2103_s28 }
  0x58   : > { %1692 = vmatpush3.bf16.msra.mxu0 %v1974_v15  ;;  %1877 = vmatpush3.bf16.msra.mxu1 %v1974_v15 }
  0x59   : > { %1693 = vmatprep.subr.bf16.mxu0 %v1975_v16  ;;  %1870 = vmatprep.subr.bf16.mxu1 %v1975_v16  ;;  %p2112_p7 = por %p2111_p5, %p2110_p2 }
  0x5b   : > { %p2113_p6 = pnand %p2112_p7, %p2106_p11 }
  0x5c   : > { %1694 = vmatpush3.bf16.msra.mxu0 %v1976_v17  ;;  %1878 = vmatpush3.bf16.msra.mxu1 %v1976_v17 }
  0x5d   : > { %1815 = vmatprep.subr.bf16.mxu1 %v1983_v18 }
  0x5f   : > { %914 = vmatmul.mubr.bf16.vlgmr.msra.gmra.mxu0 %v1977_v19  ;;  %1010 = vmatmul.mubr.bf16.vlgmr.msra.gmra.mxu1 %v1980_v20 }
  0x60   : > { %1816 = vmatpush3.bf16.msra.mxu1 %v1983_v18  ;;  %921 = vmatprep.mubr.bf16.mxu0 %v1985_v21 }
  0x61   : > { %1817 = vmatprep.subr.bf16.mxu1 %v1984_v22  ;;  %1017 = vmatprep.mubr.bf16.mxu1 %v1987_v23 }
  0x64   : > { %1818 = vmatpush3.bf16.msra.mxu1 %v1984_v22 }
  0x65   : > { %1819 = vmatprep.subr.bf16.mxu1 %v1991_v25 }
  0x67   : > { %922 = vmatmul.mubr.bf16.gmra.mxu0 %v1989_v24  ;;  %1018 = vmatmul.mubr.bf16.gmra.mxu1 %v1990_v26 }
  0x68   : > { %1820 = vmatpush3.bf16.msra.mxu1 %v1991_v25  ;;  %929 = vmatprep.mubr.bf16.mxu0 %v1993_v28 }
  0x69   : > { %1821 = vmatprep.subr.bf16.mxu1 %v1992_v27  ;;  %1025 = vmatprep.mubr.bf16.mxu1 %v1995_v29 }
  0x6c   : > { %1822 = vmatpush3.bf16.msra.mxu1 %v1992_v27 }
  0x6d   : > { %1823 = vmatprep.subr.bf16.mxu1 %v1999_v30 }
  0x6f   : > { %930 = vmatmul.mubr.bf16.gmra.mxu0 %v1997_v31  ;;  %1026 = vmatmul.mubr.bf16.gmra.mxu1 %v1998_v32 }
  0x70   : > { %1824 = vmatpush3.bf16.msra.mxu1 %v1999_v30  ;;  %937 = vmatprep.mubr.bf16.mxu0 %v2001_v34 }
  0x71   : > { %1825 = vmatprep.subr.bf16.mxu1 %v2000_v33  ;;  %1033 = vmatprep.mubr.bf16.mxu1 %v2003_v35 }
  0x74   : > { %1826 = vmatpush3.bf16.msra.mxu1 %v2000_v33 }
  0x75   : > { %1827 = vmatprep.subr.bf16.mxu1 %v2007_v36 }
  0x77   : > { %938 = vmatmul.mubr.bf16.gmra.mxu0 %v2005_v37  ;;  %1034 = vmatmul.mubr.bf16.gmra.mxu1 %v2006_v38 }
  0x78   : > { %1828 = vmatpush3.bf16.msra.mxu1 %v2007_v36  ;;  %945 = vmatprep.mubr.bf16.mxu0 %v2009_v39 }
  0x79   : > { %1829 = vmatprep.subr.bf16.mxu1 %v2008_v40  ;;  %1831 = vmatprep.mubr.bf16.mxu1 %v2011_v41 }
  0x7c   : > { %1830 = vmatpush3.bf16.msra.mxu1 %v2008_v40 }
  0x7f   : > { %946 = vmatmul.mubr.bf16.gmra.mxu0 %v2012_v42  ;;  %1832 = vmatmul.mubr.bf16.vlgmr.msra.gmra.mxu1 %v2013_v43 }
  0x80   : > { %953 = vmatprep.mubr.bf16.mxu0 %v2014_v44  ;;  %1835 = vmatprep.mubr.bf16.mxu1 %v2016_v45 }
  0x87   : > { %954 = vmatmul.mubr.bf16.gmra.mxu0 %v2017_v46  ;;  %1836 = vmatmul.mubr.bf16.gmra.mxu1 %v2018_v47 }
  0x88   : > { %961 = vmatprep.mubr.bf16.mxu0 %v2019_v48  ;;  %1839 = vmatprep.mubr.bf16.mxu1 %v2021_v49  ;;  %v2417_v49 = vld [vmem:[%s2599_s2] ss:$0 sm:$0xff] }
  0x8f   : > { %962 = vmatmul.mubr.bf16.gmra.mxu0 %v2022_v50  ;;  %1840 = vmatmul.mubr.bf16.gmra.mxu1 %v2023_v51 }
  0x90   : > { %969 = vmatprep.mubr.bf16.mxu0 %v2024_v52  ;;  %1843 = vmatprep.mubr.bf16.mxu1 %v2026_v53  ;;  %v2422_v52 = vld [vmem:[%s2600_s3] ss:$0 sm:$0xff] }
  0x97   : > { %970 = vmatmul.mubr.bf16.gmra.mxu0 %v2027_v54  ;;  %1844 = vmatmul.mubr.bf16.gmra.mxu1 %v2028_v55 }
  0x98   : > { %977 = vmatprep.mubr.bf16.mxu0 %v2029_v56  ;;  %1847 = vmatprep.mubr.bf16.mxu1 %v2031_v57 }
  0x9f   : > { %978 = vmatmul.mubr.bf16.gmra.mxu0 %v2032_v58  ;;  %1848 = vmatmul.mubr.bf16.gmra.mxu1 %v2033_v59 }
  0xa0   : > { %985 = vmatprep.mubr.bf16.mxu0 %v2034_v60  ;;  %1851 = vmatprep.mubr.bf16.mxu1 %v2036_v61 }
  0xa7   : > { %986 = vmatmul.mubr.bf16.gmra.mxu0 %v2037_v62  ;;  %1852 = vmatmul.mubr.bf16.gmra.mxu1 %v2038_v63 }
  0xa8   : > { %993 = vmatprep.mubr.bf16.mxu0 %v2039_v0  ;;  %1855 = vmatprep.mubr.bf16.mxu1 %v2041_v1 }
  0xaf   : > { %994 = vmatmul.mubr.bf16.gmra.mxu0 %v2042_v2  ;;  %1856 = vmatmul.mubr.bf16.gmra.mxu1 %v2043_v3 }
  0xb0   : > { %1001 = vmatprep.mubr.bf16.mxu0 %v2044_v4  ;;  %1859 = vmatprep.mubr.bf16.mxu1 %v2046_v5 }
  0xb7   : > { %1002 = vmatmul.mubr.bf16.gmra.mxu0 %v2047_v6  ;;  %1860 = vmatmul.mubr.bf16.gmra.mxu1 %v2048_v7 }
 0x11f   : > { %v1695_v8 = vpop.f32.mrf.mxu0  ;;  %v1767_v9 = vpop.f32.mrf.mxu1 }
 0x121   : > { %v1696_v10 = vpop.f32.mrf.mxu0  ;;  %v1768_v11 = vpop.f32.mrf.mxu1 }
 0x122   : > { %v2394_v12 = vadd.f32 %v1768_v11, %v1767_v9  ;;  %v1697_v50 = vadd.f32 %v1696_v10, %v1695_v8 }
 0x123   : > { %v1698_v13 = vpop.f32.mrf.mxu0  ;;  %v1770_v14 = vpop.f32.mrf.mxu1 }
 0x125   : > { %v1699_v15 = vpop.f32.mrf.mxu0  ;;  %v1771_v16 = vpop.f32.mrf.mxu1 }
 0x126   : > { %v2396_v17 = vadd.f32 %v1771_v16, %v1770_v14  ;;  %v1700_v63 = vadd.f32 %v1699_v15, %v1698_v13 }
 0x127   : > { %v1701_v18 = vpop.f32.mrf.mxu0  ;;  %v1773_v19 = vpop.f32.mrf.mxu1 }
 0x129   : > { %v1702_v20 = vpop.f32.mrf.mxu0  ;;  %v1774_v21 = vpop.f32.mrf.mxu1 }
 0x12a   : > { %v2398_v22 = vadd.f32 %v1774_v21, %v1773_v19  ;;  %v1703_v46 = vadd.f32 %v1702_v20, %v1701_v18 }
 0x12b   : > { %v1704_v23 = vpop.f32.mrf.mxu0  ;;  %v1776_v24 = vpop.f32.mrf.mxu1 }
 0x12d   : > { %v1705_v25 = vpop.f32.mrf.mxu0  ;;  %v1777_v26 = vpop.f32.mrf.mxu1 }
 0x12e   : > { %v2400_v27 = vadd.f32 %v1777_v26, %v1776_v24  ;;  %v1706_v55 = vadd.f32 %v1705_v25, %v1704_v23 }
 0x12f   : > { %v1707_v28 = vpop.f32.mrf.mxu0  ;;  %v1779_v29 = vpop.f32.mrf.mxu1 }
 0x131   : > { %v1708_v30 = vpop.f32.mrf.mxu0  ;;  %v1780_v31 = vpop.f32.mrf.mxu1 }
 0x132   : > { %v2402_v32 = vadd.f32 %v1780_v31, %v1779_v29  ;;  %v1709_v9 = vadd.f32 %v1708_v30, %v1707_v28 }
 0x133   : > { %v1710_v33 = vpop.f32.mrf.mxu0  ;;  %v1782_v34 = vpop.f32.mrf.mxu1 }
 0x135   : > { %v1711_v35 = vpop.f32.mrf.mxu0  ;;  %v1783_v36 = vpop.f32.mrf.mxu1 }
 0x136   : > { %v2404_v37 = vadd.f32 %v1783_v36, %v1782_v34  ;;  %v1712_v30 = vadd.f32 %v1711_v35, %v1710_v33 }
 0x137   : > { %v1713_v38 = vpop.f32.mrf.mxu0  ;;  %v2406_v39 = vpop.f32.mrf.mxu1 }
 0x139   : > { %v1714_v40 = vpop.f32.mrf.mxu0  ;;  %v2408_v41 = vpop.f32.mrf.mxu1 }
 0x13a   : > { %v1715_v2 = vadd.f32 %v1714_v40, %v1713_v38 }
 0x13b   : > { %v1716_v42 = vpop.f32.mrf.mxu0  ;;  %v2410_v43 = vpop.f32.mrf.mxu1 }
 0x13d   : > { %v1717_v44 = vpop.f32.mrf.mxu0  ;;  %v2412_v45 = vpop.f32.mrf.mxu1 }
 0x13e   : > { %v1718_v18 = vadd.f32 %v1717_v44, %v1716_v42 }
 0x13f   : > { %v1719_v47 = vpop.f32.mrf.mxu0  ;;  %v1833_v48 = vpop.f32.mrf.mxu1 }
 0x140   : > { %v1085_v51 = vadd.f32 %v1833_v48, %v1703_v46 }
 0x141   : > { %v1720_v53 = vpop.f32.mrf.mxu0  ;;  %v1076_v54 = vpop.f32.mrf.mxu1 }
 0x142   : > { %v1311_v56 = vmul.f32 %v2417_v49, %v1085_v51  ;;  %v1077_v57 = vadd.f32 %v1697_v50, %v1076_v54  ;;  %v1721_v51 = vadd.f32 %v1720_v53, %v1719_v47 }
 0x143   : > { %v2426_v58 = vpop.f32.mrf.mxu0  ;;  %v1834_v59 = vpop.f32.mrf.mxu1 }
 0x144   : > { %v1350_v60 = vadd.f32 %v2422_v52, %v1311_v56  ;;  %v1309_v61 = vmul.f32 %v2417_v49, %v1077_v57  ;;  %v1088_v62 = vadd.f32 %v1834_v59, %v1706_v55 }
 0x145   : > { %v1723_v0 = vpop.f32.mrf.mxu0  ;;  %v1079_v1 = vpop.f32.mrf.mxu1 }
 0x146   : > { %v1382_v3 = vmax.f32 %v1350_v60, 0.0  ;;  %v1348_v4 = vadd.f32 %v2422_v52, %v1309_v61  ;;  %v1312_v5 = vmul.f32 %v2417_v49, %v1088_v62  ;;  %v1080_v6 = vadd.f32 %v1700_v63, %v1079_v1 }
 0x147   : > { %v1725_v7 = vpop.f32.mrf.mxu0  ;;  %v1837_v8 = vpop.f32.mrf.mxu1 }
 0x148   : > { %1414 = vst [vmem:[%s2432_s8 + $0x10] sm:$0xff] %v1382_v3  ;;  %v1380_v10 = vmax.f32 %v1348_v4, 0.0  ;;  %v1351_v11 = vadd.f32 %v2422_v52, %v1312_v5  ;;  %v1101_v13 = vadd.f32 %v1837_v8, %v1715_v2  ;;  %v1310_v14 = vmul.f32 %v2417_v49, %v1080_v6 }
 0x149   : > { %v1726_v15 = vpop.f32.mrf.mxu0  ;;  %v1092_v16 = vpop.f32.mrf.mxu1  ;;  %v1724_v4 = vadd.f32 %v1723_v0, %v2426_v58 }
 0x14a   : > { %1412 = vst [vmem:[%s2432_s8] sm:$0xff] %v1380_v10  ;;  %v1383_v19 = vmax.f32 %v1351_v11, 0.0  ;;  %v1315_v20 = vmul.f32 %v2417_v49, %v1101_v13  ;;  %v1093_v21 = vadd.f32 %v1709_v9, %v1092_v16  ;;  %v1349_v23 = vadd.f32 %v2422_v52, %v1310_v14 }
 0x14b   : > { %v1728_v24 = vpop.f32.mrf.mxu0  ;;  %v1838_v25 = vpop.f32.mrf.mxu1  ;;  %v1727_v40 = vadd.f32 %v1726_v15, %v1725_v7 }
 0x14c   : > { %1415 = vst [vmem:[%s2432_s8 + $0x18] sm:$0xff] %v1383_v19  ;;  %v1354_v26 = vadd.f32 %v2422_v52, %v1315_v20  ;;  %v1313_v28 = vmul.f32 %v2417_v49, %v1093_v21  ;;  %v1104_v29 = vadd.f32 %v1838_v25, %v1718_v18  ;;  %v1381_v31 = vmax.f32 %v1349_v23, 0.0 }
 0x14d   : > { %v1729_v34 = vpop.f32.mrf.mxu0  ;;  %v1095_v36 = vpop.f32.mrf.mxu1 }
 0x14e   : > { %v1386_v38 = vmax.f32 %v1354_v26, 0.0  ;;  %v1352_v42 = vadd.f32 %v2422_v52, %v1313_v28  ;;  %v1316_v44 = vmul.f32 %v2417_v49, %v1104_v29  ;;  %1413 = vst [vmem:[%s2432_s8 + $0x8] sm:$0xff] %v1381_v31  ;;  %v1096_v46 = vadd.f32 %v1712_v30, %v1095_v36 }
 0x14f   : > { %v1731_v48 = vpop.f32.mrf.mxu0  ;;  %v1841_v50 = vpop.f32.mrf.mxu1  ;;  %v1730_v60 = vadd.f32 %v1729_v34, %v1728_v24 }
 0x150   : > { %1418 = vst [vmem:[%s2432_s8 + $0x30] sm:$0xff] %v1386_v38  ;;  %v1384_v54 = vmax.f32 %v1352_v42, 0.0  ;;  %v1355_v33 = vadd.f32 %v2422_v52, %v1316_v44  ;;  %v1117_v35 = vadd.f32 %v1841_v50, %v1727_v40  ;;  %v1314_v55 = vmul.f32 %v2417_v49, %v1096_v46 }
 0x151   : > { %v1732_v56 = vpop.f32.mrf.mxu0  ;;  %v1108_v57 = vpop.f32.mrf.mxu1 }
 0x152   : > { %1416 = vst [vmem:[%s2432_s8 + $0x20] sm:$0xff] %v1384_v54  ;;  %v1387_v59 = vmax.f32 %v1355_v33, 0.0  ;;  %v1319_v61 = vmul.f32 %v2417_v49, %v1117_v35  ;;  %v1109_v62 = vadd.f32 %v1721_v51, %v1108_v57  ;;  %v1353_v63 = vadd.f32 %v2422_v52, %v1314_v55 }
 0x153   : > { %v1734_v47 = vpop.f32.mrf.mxu0  ;;  %v1842_v53 = vpop.f32.mrf.mxu1  ;;  %v1733_v15 = vadd.f32 %v1732_v56, %v1731_v48 }
 0x154   : > { %1419 = vst [vmem:[%s2432_s8 + $0x38] sm:$0xff] %v1387_v59  ;;  %v1358_v1 = vadd.f32 %v2422_v52, %v1319_v61  ;;  %v1317_v2 = vmul.f32 %v2417_v49, %v1109_v62  ;;  %v1120_v3 = vadd.f32 %v1842_v53, %v1730_v60  ;;  %v1385_v5 = vmax.f32 %v1353_v63, 0.0 }
 0x155   : > { %v1735_v6 = vpop.f32.mrf.mxu0  ;;  %v1111_v7 = vpop.f32.mrf.mxu1 }
 0x156   : > { %v1390_v8 = vmax.f32 %v1358_v1, 0.0  ;;  %v1356_v9 = vadd.f32 %v2422_v52, %v1317_v2  ;;  %v1320_v10 = vmul.f32 %v2417_v49, %v1120_v3  ;;  %1417 = vst [vmem:[%s2432_s8 + $0x28] sm:$0xff] %v1385_v5  ;;  %v1112_v11 = vadd.f32 %v1724_v4, %v1111_v7 }
 0x157   : > { %v1737_v13 = vpop.f32.mrf.mxu0  ;;  %v1845_v14 = vpop.f32.mrf.mxu1  ;;  %v1736_v28 = vadd.f32 %v1735_v6, %v1734_v47 }
 0x158   : > { %1422 = vst [vmem:[%s2432_s8 + $0x50] sm:$0xff] %v1390_v8  ;;  %v1388_v16 = vmax.f32 %v1356_v9, 0.0  ;;  %v1359_v18 = vadd.f32 %v2422_v52, %v1320_v10  ;;  %v1318_v58 = vmul.f32 %v2417_v49, %v1112_v11 }
 0x159   : > { %v1738_v0 = vpop.f32.mrf.mxu0  ;;  %v1124_v19 = vpop.f32.mrf.mxu1 }
 0x15a   : > { %1420 = vst [vmem:[%s2432_s8 + $0x40] sm:$0xff] %v1388_v16  ;;  %v1391_v20 = vmax.f32 %v1359_v18, 0.0  ;;  %v1739_v21 = vadd.f32 %v1738_v0, %v1737_v13  ;;  %v1125_v23 = vadd.f32 %v1733_v15, %v1124_v19  ;;  %v1357_v24 = vadd.f32 %v2422_v52, %v1318_v58 }
 0x15b   : > { %v1740_v25 = vpop.f32.mrf.mxu0  ;;  %v1846_v26 = vpop.f32.mrf.mxu1 }
 0x15c   : > { %1423 = vst [vmem:[%s2432_s8 + $0x58] sm:$0xff] %v1391_v20  ;;  %v1133_v29 = vadd.f32 %v1845_v14, %v1739_v21  ;;  %v1321_v30 = vmul.f32 %v2417_v49, %v1125_v23  ;;  %v1389_v31 = vmax.f32 %v1357_v24, 0.0 }
 0x15d   : > { %v1741_v34 = vpop.f32.mrf.mxu0  ;;  %v1127_v36 = vpop.f32.mrf.mxu1 }
 0x15e   : > { %v1323_v38 = vmul.f32 %v2417_v49, %v1133_v29  ;;  %v1360_v40 = vadd.f32 %v2422_v52, %v1321_v30  ;;  %v1742_v42 = vadd.f32 %v1741_v34, %v1740_v25  ;;  %v1128_v44 = vadd.f32 %v1736_v28, %v1127_v36  ;;  %1421 = vst [vmem:[%s2432_s8 + $0x48] sm:$0xff] %v1389_v31 }
 0x15f   : > { %v1743_v46 = vpop.f32.mrf.mxu0  ;;  %v1849_v48 = vpop.f32.mrf.mxu1 }
 0x160   : > { %v1362_v50 = vadd.f32 %v2422_v52, %v1323_v38  ;;  %v1392_v51 = vmax.f32 %v1360_v40, 0.0  ;;  %v1136_v54 = vadd.f32 %v1846_v26, %v1742_v42  ;;  %v1322_v33 = vmul.f32 %v2417_v49, %v1128_v44 }
 0x161   : > { %v1744_v35 = vpop.f32.mrf.mxu0  ;;  %v1140_v55 = vpop.f32.mrf.mxu1 }
 0x162   : > { %v1394_v56 = vmax.f32 %v1362_v50, 0.0  ;;  %1424 = vst [vmem:[%s2432_s8 + $0x60] sm:$0xff] %v1392_v51  ;;  %v1324_v57 = vmul.f32 %v2417_v49, %v1136_v54  ;;  %v1361_v59 = vadd.f32 %v2422_v52, %v1322_v33  ;;  %v1745_v60 = vadd.f32 %v1744_v35, %v1743_v46 }
 0x163   : > { %v1746_v61 = vpop.f32.mrf.mxu0  ;;  %v1850_v62 = vpop.f32.mrf.mxu1  ;;  %v1787_v33 = vadd.f32 %v2408_v41, %v2406_v39 }
 0x164   : > { %1426 = vst [vmem:[%s2432_s8 + $0x70] sm:$0xff] %v1394_v56  ;;  %v1363_v63 = vadd.f32 %v2422_v52, %v1324_v57  ;;  %v1393_v47 = vmax.f32 %v1361_v59, 0.0  ;;  %v1141_v53 = vadd.f32 %v1745_v60, %v1140_v55 }
 0x165   : > { %v1747_v1 = vpop.f32.mrf.mxu0  ;;  %v1143_v2 = vpop.f32.mrf.mxu1 }
 0x166   : > { %v1395_v3 = vmax.f32 %v1363_v63, 0.0  ;;  %1425 = vst [vmem:[%s2432_s8 + $0x68] sm:$0xff] %v1393_v47  ;;  %v1325_v4 = vmul.f32 %v2417_v49, %v1141_v53  ;;  %v1748_v5 = vadd.f32 %v1747_v1, %v1746_v61  ;;  %v1790_v1 = vadd.f32 %v2412_v45, %v2410_v43 }
 0x167   : > { %v1749_v6 = vpop.f32.mrf.mxu0  ;;  %v2478_v7 = vpop.f32.mrf.mxu1 }
 0x168   : > { %1427 = vst [vmem:[%s2432_s8 + $0x78] sm:$0xff] %v1395_v3  ;;  %v1364_v8 = vadd.f32 %v2422_v52, %v1325_v4  ;;  %v1144_v9 = vadd.f32 %v1748_v5, %v1143_v2 }
 0x169   : > { %v1750_v10 = vpop.f32.mrf.mxu0  ;;  %v1156_v11 = vpop.f32.mrf.mxu1 }
 0x16a   : > { %v1396_v13 = vmax.f32 %v1364_v8, 0.0  ;;  %v1326_v14 = vmul.f32 %v2417_v49, %v1144_v9  ;;  %v1751_v15 = vadd.f32 %v1750_v10, %v1749_v6 }
 0x16b   : > { %v1752_v16 = vpop.f32.mrf.mxu0  ;;  %v2483_v18 = vpop.f32.mrf.mxu1 }
 0x16c   : > { %1428 = vst [vmem:[%s2432_s8 + $0x80] sm:$0xff] %v1396_v13  ;;  %v1365_v58 = vadd.f32 %v2422_v52, %v1326_v14  ;;  %v1149_v0 = vadd.f32 %v1849_v48, %v1751_v15 }
 0x16d   : > { %v1753_v19 = vpop.f32.mrf.mxu0  ;;  %v1159_v20 = vpop.f32.mrf.mxu1 }
 0x16e   : > { %v1397_v21 = vmax.f32 %v1365_v58, 0.0  ;;  %v1327_v23 = vmul.f32 %v2417_v49, %v1149_v0  ;;  %v1754_v24 = vadd.f32 %v1753_v19, %v1752_v16 }
 0x16f   : > { %v1755_v25 = vpop.f32.mrf.mxu0  ;;  %v1857_v26 = vpop.f32.mrf.mxu1 }
 0x170   : > { %1429 = vst [vmem:[%s2432_s8 + $0x88] sm:$0xff] %v1397_v21  ;;  %v1366_v28 = vadd.f32 %v2422_v52, %v1327_v23  ;;  %v1152_v29 = vadd.f32 %v1850_v62, %v1754_v24  ;;  %v1181_v30 = vadd.f32 %v1857_v26, %v2398_v22 }
 0x171   : > { %v1756_v31 = vpop.f32.mrf.mxu0  ;;  %v1172_v34 = vpop.f32.mrf.mxu1 }
 0x172   : > { %v1398_v36 = vmax.f32 %v1366_v28, 0.0  ;;  %v1328_v38 = vmul.f32 %v2417_v49, %v1152_v29  ;;  %v1335_v40 = vmul.f32 %v2417_v49, %v1181_v30  ;;  %v1757_v42 = vadd.f32 %v1756_v31, %v1755_v25 }
 0x173   : > { %v1173_v44 = vadd.f32 %v2394_v12, %v1172_v34  ;;  %v1758_v46 = vpop.f32.mrf.mxu0  ;;  %v1858_v48 = vpop.f32.mrf.mxu1 }
 0x174   : > { %1430 = vst [vmem:[%s2432_s8 + $0x90] sm:$0xff] %v1398_v36  ;;  %v1367_v50 = vadd.f32 %v2422_v52, %v1328_v38  ;;  %v1374_v51 = vadd.f32 %v2422_v52, %v1335_v40  ;;  %v1157_v54 = vadd.f32 %v1757_v42, %v1156_v11  ;;  %v1184_v22 = vadd.f32 %v1858_v48, %v2400_v27 }
 0x175   : > { %v1333_v35 = vmul.f32 %v2417_v49, %v1173_v44  ;;  %v1759_v55 = vpop.f32.mrf.mxu0  ;;  %v1175_v56 = vpop.f32.mrf.mxu1 }
 0x176   : > { %v1399_v12 = vmax.f32 %v1367_v50, 0.0  ;;  %v1406_v57 = vmax.f32 %v1374_v51, 0.0  ;;  %v1329_v59 = vmul.f32 %v2417_v49, %v1157_v54  ;;  %v1336_v60 = vmul.f32 %v2417_v49, %v1184_v22 }
 0x177   : > { %v1372_v61 = vadd.f32 %v2422_v52, %v1333_v35  ;;  %v1760_v62 = vadd.f32 %v1759_v55, %v1758_v46  ;;  %v1176_v63 = vadd.f32 %v2396_v17, %v1175_v56  ;;  %v1761_v47 = vpop.f32.mrf.mxu0  ;;  %v1861_v27 = vpop.f32.mrf.mxu1 }
 0x178   : > { %1431 = vst [vmem:[%s2432_s8 + $0x98] sm:$0xff] %v1399_v12  ;;  %1438 = vst [vmem:[%s2432_s8 + $0xd0] sm:$0xff] %v1406_v57  ;;  %v1368_v39 = vadd.f32 %v2422_v52, %v1329_v59  ;;  %v1375_v41 = vadd.f32 %v2422_v52, %v1336_v60  ;;  %v1197_v53 = vadd.f32 %v1861_v27, %v1787_v33 }
 0x179   : > { %v1404_v2 = vmax.f32 %v1372_v61, 0.0  ;;  %v1160_v3 = vadd.f32 %v1760_v62, %v1159_v20  ;;  %v1334_v4 = vmul.f32 %v2417_v49, %v1176_v63  ;;  %v1762_v17 = vpop.f32.mrf.mxu0  ;;  %v1188_v5 = vpop.f32.mrf.mxu1 }
 0x17a   : > { %v1400_v6 = vmax.f32 %v1368_v39, 0.0  ;;  %v1407_v8 = vmax.f32 %v1375_v41, 0.0  ;;  %v1339_v9 = vmul.f32 %v2417_v49, %v1197_v53  ;;  %v1763_v10 = vadd.f32 %v1762_v17, %v1761_v47 }
 0x17b   : > { %1436 = vst [vmem:[%s2432_s8 + $0xc0] sm:$0xff] %v1404_v2  ;;  %v1330_v11 = vmul.f32 %v2417_v49, %v1160_v3  ;;  %v1373_v13 = vadd.f32 %v2422_v52, %v1334_v4  ;;  %v1189_v43 = vadd.f32 %v2402_v32, %v1188_v5  ;;  %v1764_v45 = vpop.f32.mrf.mxu0  ;;  %v1862_v14 = vpop.f32.mrf.mxu1 }
 0x17c   : > { %1432 = vst [vmem:[%s2432_s8 + $0xa0] sm:$0xff] %v1400_v6  ;;  %1439 = vst [vmem:[%s2432_s8 + $0xd8] sm:$0xff] %v1407_v8  ;;  %v1378_v15 = vadd.f32 %v2422_v52, %v1339_v9  ;;  %v1165_v16 = vadd.f32 %v2478_v7, %v1763_v10  ;;  %v1200_v58 = vadd.f32 %v1862_v14, %v1790_v1 }
 0x17d   : > { %v1369_v0 = vadd.f32 %v2422_v52, %v1330_v11  ;;  %v1405_v19 = vmax.f32 %v1373_v13, 0.0  ;;  %v1337_v20 = vmul.f32 %v2417_v49, %v1189_v43  ;;  %v1765_v21 = vpop.f32.mrf.mxu0  ;;  %v1191_v23 = vpop.f32.mrf.mxu1 }
 0x17e   : > { %v1410_v32 = vmax.f32 %v1378_v15, 0.0  ;;  %v1331_v24 = vmul.f32 %v2417_v49, %v1165_v16  ;;  %v1340_v25 = vmul.f32 %v2417_v49, %v1200_v58  ;;  %v1766_v26 = vadd.f32 %v1765_v21, %v1764_v45 }
 0x17f   : > { %v1401_v28 = vmax.f32 %v1369_v0, 0.0  ;;  %1437 = vst [vmem:[%s2432_s8 + $0xc8] sm:$0xff] %v1405_v19  ;;  %v1376_v7 = vadd.f32 %v2422_v52, %v1337_v20  ;;  %v1192_v29 = vadd.f32 %v2404_v37, %v1191_v23 }
 0x180   : > { %1442 = vst [vmem:[%s2432_s8 + $0xf0] sm:$0xff] %v1410_v32  ;;  %v1370_v30 = vadd.f32 %v2422_v52, %v1331_v24  ;;  %v1379_v31 = vadd.f32 %v2422_v52, %v1340_v25  ;;  %v1168_v34 = vadd.f32 %v2483_v18, %v1766_v26 }
 0x181   : > { %1433 = vst [vmem:[%s2432_s8 + $0xa8] sm:$0xff] %v1401_v28  ;;  %v1408_v36 = vmax.f32 %v1376_v7, 0.0  ;;  %v1338_v38 = vmul.f32 %v2417_v49, %v1192_v29 }
 0x182   : > { %v1402_v40 = vmax.f32 %v1370_v30, 0.0  ;;  %v1411_v42 = vmax.f32 %v1379_v31, 0.0  ;;  %v1332_v44 = vmul.f32 %v2417_v49, %v1168_v34 }
 0x183   : > { %1440 = vst [vmem:[%s2432_s8 + $0xe0] sm:$0xff] %v1408_v36  ;;  %v1377_v37 = vadd.f32 %v2422_v52, %v1338_v38 }
 0x184   : > { %1434 = vst [vmem:[%s2432_s8 + $0xb0] sm:$0xff] %v1402_v40  ;;  %1443 = vst [vmem:[%s2432_s8 + $0xf8] sm:$0xff] %v1411_v42  ;;  %v1371_v18 = vadd.f32 %v2422_v52, %v1332_v44 }
 0x185   : > { %v1409_v46 = vmax.f32 %v1377_v37, 0.0 }
 0x186   : > { %v1403_v49 = vmax.f32 %v1371_v18, 0.0 }
 0x187   : > { %1441 = vst [vmem:[%s2432_s8 + $0xe8] sm:$0xff] %v1409_v46 }
 0x188   : > { %1435 = vst [vmem:[%s2432_s8 + $0xb8] sm:$0xff] %v1403_v49 }
 0x189   : > { %2116 = shalt.err (!%p2113_p6)
}
 0x18a   : > { %s2117_s23 = scalar_lea.hbm %s2545_s29, 4096  ;;  %s2121_s30 = scalar_lea.hbm %s2601_s4, 8192 }
 0x18b   : > { %p2118_p4 = scmp.ne.s32.totalorder %s2545_s29, %s2117_s23  ;;  %p2122_p0 = scmp.lt.s32.totalorder %s2545_s29, %s2601_s4 }
 0x18c   : > { %p2123_p3 = scmp.lt.s32.totalorder %s2121_s30, %s2117_s23 }
 0x18d   : > { %p2119_p9 = pnand %p2118_p4, %p2306_p13 }
 0x18e   : > { %p2124_p1 = por %p2123_p3, %p2122_p0 }
 0x18f   : > { %p2120_p12 = pneg %p2119_p9 }
 0x191   : > { %p2125_p8 = pnand %p2124_p1, %p2120_p12 }
 0x193   : > { %2128 = shalt.err (!%p2125_p8)
}
 0x194   : > { %s2196_s9 = smov 128   ;;  %s2197_s13 = smov 8  }
 0x195   : > { %1888 = dma.vmem_to_hbm [thread:$0]  (%p2306_p13), %s2547_s11, 4096, %s2545_s29, %s1445_s18, %s2196_s9, %s2196_s9, %s2197_s13  }
 0x196 PF: > { %s1474_s21 = sand.u32 1, %s2167_s15   ;;  %p2612_p11 = scmp.ne.s32.totalorder %s2606_s26, 0 }
 0x197   : > { %s1475_s28 = scalar_lea.sflag [#allocation5], %s1474_s21 }
 0x198   : > { %p1899_p2 = pnand %p1592_p10, %p2612_p11 }
 0x19a   : > { %p1900_p5 = pneg %p1899_p2 }
 0x19c   : > { %2162 = dma.done.wait (%p1900_p5), %s1475_s28, 4096  }
 0x19d   : > { %2164 = vsyncadd (%p1900_p5), %s1475_s28, 4294963200  ;;  %s21_s20 = sadd.s32 1, %s2187_s20   ;;  %s2613_s15 = smov %s2171_s16 }
 0x19e   : > { %p18_p7 = scmp.ge.s32.totalorder %s21_s20, 4   ;;  %s2614_s16 = smov %s2175_s17 }
 0x19f   : > { %s2615_s17 = smov %s2315_s22  ;;  %s2616_s18 = smov %s2183_s19 }
 0x1a0   : > { %s2617_s19 = smov %s2619_s5  ;;  %20 = sbr.rel (!%p18_p7) target bundleno = 7 (0x7), region = 100 }
 0x1a5   :  { %1480 = vsyncpa [#allocation4], 1 }
 0x1a6   :  { %1482 = vsyncpa [#allocation4 + $0x1], 1 }
 0x1a7   :  { %1483 = vsyncpa [#allocation7], 1 }
 0x1a8   :  { %1484 = vsyncpa [#allocation5], 1 }
 0x1a9   :  { %1486 = vsyncpa [#allocation5 + $0x1], 1 }

</bundles_post_ra>
